<compile_context>
chip_gen: v7x
topology: tpu7x:2x2x1
jax: 0.10.0
libtpu: 0.0.40
codegen_flags: <defaults>
</compile_context>

<pallas_src>
import functools

import jax
import jax.numpy as jnp
from jax.experimental import pallas as pl
from jax.experimental.pallas import tpu as pltpu

PAD = 128          # lane-friendly feature width for all hidden/output dims
IN_DIM = 28 * 28   # flattened MNIST input width


def _sigmoid(h):
    # 0.5*tanh(0.5*h)+0.5 == sigmoid(h); tanh rides the EUP slot.
    return 0.5 * jnp.tanh(0.5 * h) + 0.5


def _mlp_kernel(x_ref,
                w1_ref, b1_ref,
                w2_ref, b2_ref,
                w3_ref, b3_ref,
                w4_ref, b4_ref,
                out_ref):
    """Fused 4-layer MLP: 3x (matmul + bias + sigmoid) + final matmul + bias.

    x arrives f32 (producer dtype) and is cast to bf16 in-kernel; weights are
    pre-packed bf16; every dot accumulates in f32; bias-add / sigmoid run in
    f32; activations are cast back to bf16 only as MXU inputs.
    """
    x = x_ref[...].astype(jnp.bfloat16)   # in-kernel cast: no separate convert pass

    h = jnp.dot(x, w1_ref[...], preferred_element_type=jnp.float32) + b1_ref[...]
    h = _sigmoid(h)

    h = jnp.dot(h.astype(jnp.bfloat16), w2_ref[...],
                preferred_element_type=jnp.float32) + b2_ref[...]
    h = _sigmoid(h)

    h = jnp.dot(h.astype(jnp.bfloat16), w3_ref[...],
                preferred_element_type=jnp.float32) + b3_ref[...]
    h = _sigmoid(h)

    logits = jnp.dot(h.astype(jnp.bfloat16), w4_ref[...],
                     preferred_element_type=jnp.float32) + b4_ref[...]
    out_ref[...] = logits.astype(out_ref.dtype)


def _pad_to(arr, shape):
    """Zero-pad `arr` up to `shape` (zero padding is required for correctness)."""
    pads = [(0, t - s) for s, t in zip(arr.shape, shape)]
    return jnp.pad(arr, pads)


def pack_params(params):
    """One-time param transform: zero-pad feature dims to 128, cast weights to
    bf16 (biases stay f32: added to the f32 accumulator).  Call once, reuse."""
    (w1, b1), (w2, b2), (w3, b3), (w4, b4) = params
    out_dim = int(w4.shape[1])
    packed = (
        _pad_to(w1, (w1.shape[0], PAD)).astype(jnp.bfloat16),
        _pad_to(b1, (1, PAD)).astype(jnp.float32),
        _pad_to(w2, (PAD, PAD)).astype(jnp.bfloat16),
        _pad_to(b2, (1, PAD)).astype(jnp.float32),
        _pad_to(w3, (PAD, PAD)).astype(jnp.bfloat16),
        _pad_to(b3, (1, PAD)).astype(jnp.float32),
        _pad_to(w4, (PAD, PAD)).astype(jnp.bfloat16),
        _pad_to(b4, (1, PAD)).astype(jnp.float32),
    )
    return packed, out_dim


def _round_up(x, m):
    return ((x + m - 1) // m) * m


def _pick_batch_tile(B, batch_tile):
    if batch_tile is not None:
        tb = int(batch_tile)
        if tb >= B:
            return B
        return max(16, _round_up(tb, 16))   # guard: multiple of 16 or == B
    if B <= 64:
        return B                            # single tile; block == full dim
    # >= 2 "parallel" grid steps (v7x has 2 TensorCores), tiles capped at 2048
    # rows so per-step overhead (~0.35 us) is amortized while double-buffered
    # VMEM stays well inside v7x's 64 MiB/TC.
    return min(_round_up(pl.cdiv(B, 2), 16), 2048)


@functools.partial(jax.jit, static_argnames=("out_dim", "batch_tile"))
def our_mlp_forward(x_nchw, packed_params, out_dim=100, batch_tile=None):
    """x_nchw: (B, 1, 28, 28) float32.  Returns logits (B, out_dim) float32."""
    B = x_nchw.shape[0]
    x = x_nchw.reshape(B, -1)          # nn.Flatten on NCHW (row-major) -> (B, 784)
    in_dim = x.shape[1]

    w1p, b1p, w2p, b2p, w3p, b3p, w4p, b4p = packed_params

    tb = _pick_batch_tile(B, batch_tile)
    grid = (pl.cdiv(B, tb),)

    # Weights/biases (< 0.4 MiB total) stay fully resident every grid step
    # (constant index_map => no re-fetch); only the batch dim is tiled.
    def full(shape):
        return pl.BlockSpec(shape, lambda i: (0, 0))

    cost = pl.CostEstimate(
        flops=2 * B * (in_dim * PAD + 3 * PAD * PAD),
        transcendentals=3 * B * PAD,
        bytes_accessed=B * in_dim * 4 + B * PAD * 4
        + (in_dim * PAD + 3 * PAD * PAD) * 2 + 4 * PAD * 4,
    )

    out = pl.pallas_call(
        _mlp_kernel,
        out_shape=jax.ShapeDtypeStruct((B, PAD), jnp.float32),
        grid_spec=pltpu.PrefetchScalarGridSpec(
            num_scalar_prefetch=0,
            grid=grid,
            in_specs=[
                pl.BlockSpec((tb, in_dim), lambda i: (i, 0)),   # x tile (f32)
                full(w1p.shape), full(b1p.shape),
                full(w2p.shape), full(b2p.shape),
                full(w3p.shape), full(b3p.shape),
                full(w4p.shape), full(b4p.shape),
            ],
            out_specs=pl.BlockSpec((tb, PAD), lambda i: (i, 0)),
        ),
        compiler_params=pltpu.CompilerParams(
            dimension_semantics=("parallel",),
            vmem_limit_bytes=40 * 1024 * 1024,
        ),
        cost_estimate=cost,
    )(x, w1p, b1p, w2p, b2p, w3p, b3p, w4p, b4p)

    return out[:, :out_dim]


def init_linear(key, fan_in, fan_out):
    """Deterministic init mimicking torch.nn.Linear's U(-1/sqrt(fan_in), ...).

    Weight is stored as (fan_in, fan_out) (transpose of PyTorch layout) so the
    kernel can compute x @ W.  Bias is (1, fan_out) for clean 2D broadcasting.
    """
    kw, kb = jax.random.split(key)
    bound = 1.0 / jnp.sqrt(jnp.float32(fan_in))
    w = jax.random.uniform(kw, (fan_in, fan_out), jnp.float32, -bound, bound)
    b = jax.random.uniform(kb, (1, fan_out), jnp.float32, -bound, bound)
    return w, b


def _ref_forward(x_nchw, params):
    """Pure-JAX reference using the same bf16-input / f32-accumulate scheme."""
    (w1, b1), (w2, b2), (w3, b3), (w4, b4) = params

    def lin(h, w, b):
        return jnp.dot(h.astype(jnp.bfloat16), w.astype(jnp.bfloat16),
                       preferred_element_type=jnp.float32) + b

    h = x_nchw.reshape(x_nchw.shape[0], -1)
    h = jax.nn.sigmoid(lin(h, w1, b1))
    h = jax.nn.sigmoid(lin(h, w2, b2))
    h = jax.nn.sigmoid(lin(h, w3, b3))
    return lin(h, w4, b4)


if __name__ == "__main__":
    key = jax.random.PRNGKey(0)
    k_x, k1, k2, k3, k4 = jax.random.split(key, 5)

    # Layer shapes from OurMLP.__init__:
    #   input_layer : 784 -> 50
    #   hidden1     : 50  -> 100
    #   hidden2     : 100 -> 50
    #   output_layer: 50  -> 100
    params = (
        init_linear(k1, 28 * 28, 50),
        init_linear(k2, 50, 100),
        init_linear(k3, 100, 50),
        init_linear(k4, 50, 100),
    )
    packed, out_dim = pack_params(params)   # one-time param packing

    # Small MNIST-like batch in NCHW, consistent with the 28*28 flatten.
    x = jax.random.normal(k_x, (2, 1, 28, 28), dtype=jnp.float32)

    logits = our_mlp_forward(x, packed, out_dim=out_dim)
    jax.block_until_ready(logits)

    ref = _ref_forward(x, params)
    assert logits.shape == (2, 100), logits.shape
    assert jnp.allclose(logits, ref, atol=2e-3, rtol=2e-3), "mismatch vs reference"

    # Exercise the tiled / multi-grid-step path as well (3 parallel steps).
    x_big = jax.random.normal(k_x, (48, 1, 28, 28), dtype=jnp.float32)
    logits_big = our_mlp_forward(x_big, packed, out_dim=out_dim, batch_tile=16)
    jax.block_until_ready(logits_big)
    ref_big = _ref_forward(x_big, params)
    assert logits_big.shape == (48, 100), logits_big.shape
    assert jnp.allclose(logits_big, ref_big, atol=2e-3, rtol=2e-3), "tiled mismatch"

    print("KERNEL_OK")
</pallas_src>

<mosaic_0001>
module attributes {stable_mosaic.version = 11 : i64} {
  func.func @_mlp_kernel(%arg0: i32, %arg1: memref<2x784xf32, #tpu.memory_space<vmem>>, %arg2: memref<784x128xbf16, #tpu.memory_space<vmem>>, %arg3: memref<1x128xf32, #tpu.memory_space<vmem>>, %arg4: memref<128x128xbf16, #tpu.memory_space<vmem>>, %arg5: memref<1x128xf32, #tpu.memory_space<vmem>>, %arg6: memref<128x128xbf16, #tpu.memory_space<vmem>>, %arg7: memref<1x128xf32, #tpu.memory_space<vmem>>, %arg8: memref<128x128xbf16, #tpu.memory_space<vmem>>, %arg9: memref<1x128xf32, #tpu.memory_space<vmem>>, %arg10: memref<2x128xf32, #tpu.memory_space<vmem>>) attributes {dimension_semantics = [#tpu.dimension_semantics<parallel>], iteration_bounds = array<i64: 1>, scalar_prefetch = 0 : i64, scratch_operands = 0 : i64, tpu.core_type = #tpu.core_type<tc>, window_params = [{transform_indices = @transform_0, window_bounds = array<i64: 2, 784>}, {pipeline_mode = #tpu.pipeline_mode<synchronous>, transform_indices = @transform_1, window_bounds = array<i64: 784, 128>}, {pipeline_mode = #tpu.pipeline_mode<synchronous>, transform_indices = @transform_2, window_bounds = array<i64: 1, 128>}, {pipeline_mode = #tpu.pipeline_mode<synchronous>, transform_indices = @transform_3, window_bounds = array<i64: 128, 128>}, {pipeline_mode = #tpu.pipeline_mode<synchronous>, transform_indices = @transform_4, window_bounds = array<i64: 1, 128>}, {pipeline_mode = #tpu.pipeline_mode<synchronous>, transform_indices = @transform_5, window_bounds = array<i64: 128, 128>}, {pipeline_mode = #tpu.pipeline_mode<synchronous>, transform_indices = @transform_6, window_bounds = array<i64: 1, 128>}, {pipeline_mode = #tpu.pipeline_mode<synchronous>, transform_indices = @transform_7, window_bounds = array<i64: 128, 128>}, {pipeline_mode = #tpu.pipeline_mode<synchronous>, transform_indices = @transform_8, window_bounds = array<i64: 1, 128>}, {transform_indices = @transform_9, window_bounds = array<i64: 2, 128>}]} {
    %c0 = arith.constant 0 : index
    %c0_0 = arith.constant 0 : index
    %0 = vector.load %arg1[%c0, %c0_0] : memref<2x784xf32, #tpu.memory_space<vmem>>, vector<2x784xf32>
    %1 = arith.truncf %0 : vector<2x784xf32> to vector<2x784xbf16>
    %c0_1 = arith.constant 0 : index
    %c0_2 = arith.constant 0 : index
    %2 = vector.load %arg2[%c0_1, %c0_2] : memref<784x128xbf16, #tpu.memory_space<vmem>>, vector<784x128xbf16>
    %cst = arith.constant dense<0.000000e+00> : vector<2x128xf32>
    %3 = tpu.matmul %1, %2, %cst {dimension_numbers = #tpu.dot_dimension_numbers<[1], [0], [0], [1], [0, 0, 1, 1], [], []>} : vector<2x784xbf16>, vector<784x128xbf16>, vector<2x128xf32> -> vector<2x128xf32>
    %c0_3 = arith.constant 0 : index
    %c0_4 = arith.constant 0 : index
    %4 = vector.load %arg3[%c0_3, %c0_4] : memref<1x128xf32, #tpu.memory_space<vmem>>, vector<1x128xf32>
    %5 = vector.broadcast %4 : vector<1x128xf32> to vector<2x128xf32>
    %6 = arith.addf %3, %5 : vector<2x128xf32>
    %cst_5 = arith.constant 5.000000e-01 : f32
    %7 = vector.broadcast %cst_5 : f32 to vector<2x128xf32>
    %8 = arith.mulf %7, %6 : vector<2x128xf32>
    %9 = math.tanh %8 : vector<2x128xf32>
    %cst_6 = arith.constant 5.000000e-01 : f32
    %10 = vector.broadcast %cst_6 : f32 to vector<2x128xf32>
    %11 = arith.mulf %10, %9 : vector<2x128xf32>
    %cst_7 = arith.constant 5.000000e-01 : f32
    %12 = vector.broadcast %cst_7 : f32 to vector<2x128xf32>
    %13 = arith.addf %11, %12 : vector<2x128xf32>
    %14 = arith.truncf %13 : vector<2x128xf32> to vector<2x128xbf16>
    %c0_8 = arith.constant 0 : index
    %c0_9 = arith.constant 0 : index
    %15 = vector.load %arg4[%c0_8, %c0_9] : memref<128x128xbf16, #tpu.memory_space<vmem>>, vector<128x128xbf16>
    %cst_10 = arith.constant dense<0.000000e+00> : vector<2x128xf32>
    %16 = tpu.matmul %14, %15, %cst_10 {dimension_numbers = #tpu.dot_dimension_numbers<[1], [0], [0], [1], [0, 0, 1, 1], [], []>} : vector<2x128xbf16>, vector<128x128xbf16>, vector<2x128xf32> -> vector<2x128xf32>
    %c0_11 = arith.constant 0 : index
    %c0_12 = arith.constant 0 : index
    %17 = vector.load %arg5[%c0_11, %c0_12] : memref<1x128xf32, #tpu.memory_space<vmem>>, vector<1x128xf32>
    %18 = vector.broadcast %17 : vector<1x128xf32> to vector<2x128xf32>
    %19 = arith.addf %16, %18 : vector<2x128xf32>
    %cst_13 = arith.constant 5.000000e-01 : f32
    %20 = vector.broadcast %cst_13 : f32 to vector<2x128xf32>
    %21 = arith.mulf %20, %19 : vector<2x128xf32>
    %22 = math.tanh %21 : vector<2x128xf32>
    %cst_14 = arith.constant 5.000000e-01 : f32
    %23 = vector.broadcast %cst_14 : f32 to vector<2x128xf32>
    %24 = arith.mulf %23, %22 : vector<2x128xf32>
    %cst_15 = arith.constant 5.000000e-01 : f32
    %25 = vector.broadcast %cst_15 : f32 to vector<2x128xf32>
    %26 = arith.addf %24, %25 : vector<2x128xf32>
    %27 = arith.truncf %26 : vector<2x128xf32> to vector<2x128xbf16>
    %c0_16 = arith.constant 0 : index
    %c0_17 = arith.constant 0 : index
    %28 = vector.load %arg6[%c0_16, %c0_17] : memref<128x128xbf16, #tpu.memory_space<vmem>>, vector<128x128xbf16>
    %cst_18 = arith.constant dense<0.000000e+00> : vector<2x128xf32>
    %29 = tpu.matmul %27, %28, %cst_18 {dimension_numbers = #tpu.dot_dimension_numbers<[1], [0], [0], [1], [0, 0, 1, 1], [], []>} : vector<2x128xbf16>, vector<128x128xbf16>, vector<2x128xf32> -> vector<2x128xf32>
    %c0_19 = arith.constant 0 : index
    %c0_20 = arith.constant 0 : index
    %30 = vector.load %arg7[%c0_19, %c0_20] : memref<1x128xf32, #tpu.memory_space<vmem>>, vector<1x128xf32>
    %31 = vector.broadcast %30 : vector<1x128xf32> to vector<2x128xf32>
    %32 = arith.addf %29, %31 : vector<2x128xf32>
    %cst_21 = arith.constant 5.000000e-01 : f32
    %33 = vector.broadcast %cst_21 : f32 to vector<2x128xf32>
    %34 = arith.mulf %33, %32 : vector<2x128xf32>
    %35 = math.tanh %34 : vector<2x128xf32>
    %cst_22 = arith.constant 5.000000e-01 : f32
    %36 = vector.broadcast %cst_22 : f32 to vector<2x128xf32>
    %37 = arith.mulf %36, %35 : vector<2x128xf32>
    %cst_23 = arith.constant 5.000000e-01 : f32
    %38 = vector.broadcast %cst_23 : f32 to vector<2x128xf32>
    %39 = arith.addf %37, %38 : vector<2x128xf32>
    %40 = arith.truncf %39 : vector<2x128xf32> to vector<2x128xbf16>
    %c0_24 = arith.constant 0 : index
    %c0_25 = arith.constant 0 : index
    %41 = vector.load %arg8[%c0_24, %c0_25] : memref<128x128xbf16, #tpu.memory_space<vmem>>, vector<128x128xbf16>
    %cst_26 = arith.constant dense<0.000000e+00> : vector<2x128xf32>
    %42 = tpu.matmul %40, %41, %cst_26 {dimension_numbers = #tpu.dot_dimension_numbers<[1], [0], [0], [1], [0, 0, 1, 1], [], []>} : vector<2x128xbf16>, vector<128x128xbf16>, vector<2x128xf32> -> vector<2x128xf32>
    %c0_27 = arith.constant 0 : index
    %c0_28 = arith.constant 0 : index
    %43 = vector.load %arg9[%c0_27, %c0_28] : memref<1x128xf32, #tpu.memory_space<vmem>>, vector<1x128xf32>
    %44 = vector.broadcast %43 : vector<1x128xf32> to vector<2x128xf32>
    %45 = arith.addf %42, %44 : vector<2x128xf32>
    %c0_29 = arith.constant 0 : index
    %c0_30 = arith.constant 0 : index
    %46 = vector.load %arg10[%c0_29, %c0_30] : memref<2x128xf32, #tpu.memory_space<vmem>>, vector<2x128xf32>
    tpu.vector_store %arg10[%c0_29, %c0_30], %45 {strides = array<i32>} : memref<2x128xf32, #tpu.memory_space<vmem>>, vector<2x128xf32>,
    return
  }
  func.func @transform_0(%arg0: i32) -> (i32, i32) {
    %c0_i32 = arith.constant 0 : i32
    %c0_i32_0 = arith.constant 0 : i32
    return %arg0, %c0_i32 : i32, i32
  }
  func.func @transform_1(%arg0: i32) -> (i32, i32) {
    %c0_i32 = arith.constant 0 : i32
    %c0_i32_0 = arith.constant 0 : i32
    %c0_i32_1 = arith.constant 0 : i32
    return %c0_i32, %c0_i32_0 : i32, i32
  }
  func.func @transform_2(%arg0: i32) -> (i32, i32) {
    %c0_i32 = arith.constant 0 : i32
    %c0_i32_0 = arith.constant 0 : i32
    %c0_i32_1 = arith.constant 0 : i32
    return %c0_i32, %c0_i32_0 : i32, i32
  }
  func.func @transform_3(%arg0: i32) -> (i32, i32) {
    %c0_i32 = arith.constant 0 : i32
    %c0_i32_0 = arith.constant 0 : i32
    %c0_i32_1 = arith.constant 0 : i32
    return %c0_i32, %c0_i32_0 : i32, i32
  }
  func.func @transform_4(%arg0: i32) -> (i32, i32) {
    %c0_i32 = arith.constant 0 : i32
    %c0_i32_0 = arith.constant 0 : i32
    %c0_i32_1 = arith.constant 0 : i32
    return %c0_i32, %c0_i32_0 : i32, i32
  }
  func.func @transform_5(%arg0: i32) -> (i32, i32) {
    %c0_i32 = arith.constant 0 : i32
    %c0_i32_0 = arith.constant 0 : i32
    %c0_i32_1 = arith.constant 0 : i32
    return %c0_i32, %c0_i32_0 : i32, i32
  }
  func.func @transform_6(%arg0: i32) -> (i32, i32) {
    %c0_i32 = arith.constant 0 : i32
    %c0_i32_0 = arith.constant 0 : i32
    %c0_i32_1 = arith.constant 0 : i32
    return %c0_i32, %c0_i32_0 : i32, i32
  }
  func.func @transform_7(%arg0: i32) -> (i32, i32) {
    %c0_i32 = arith.constant 0 : i32
    %c0_i32_0 = arith.constant 0 : i32
    %c0_i32_1 = arith.constant 0 : i32
    return %c0_i32, %c0_i32_0 : i32, i32
  }
  func.func @transform_8(%arg0: i32) -> (i32, i32) {
    %c0_i32 = arith.constant 0 : i32
    %c0_i32_0 = arith.constant 0 : i32
    %c0_i32_1 = arith.constant 0 : i32
    return %c0_i32, %c0_i32_0 : i32, i32
  }
  func.func @transform_9(%arg0: i32) -> (i32, i32) {
    %c0_i32 = arith.constant 0 : i32
    %c0_i32_0 = arith.constant 0 : i32
    return %arg0, %c0_i32 : i32, i32
  }
}

</mosaic_0001>

<bundles_post_ra>
// kernel: our_mlp_forward.1
= control target key start
LH: loop header
LB: loop body
LE: loop exit
PB: predicated region body
PF: predicated region fallthrough
CT: control target
= control target key end

     0   :  { %14 = vsyncpa [#allocation3], 0  ;;  %s1606_s0 = inlined_call_operand.vmem [shape: f32[2,784], index: 0, kind: input, shape index: {}]   ;;  %s1607_s1 = inlined_call_operand.hbm [shape: bf16[784,128], index: 1, kind: input, shape index: {}]   ;;  %s1608_s2 = inlined_call_operand.vmem [shape: f32[1,128], index: 2, kind: input, shape index: {}]   ;;  %s1609_s3 = inlined_call_operand.vmem [shape: bf16[128,128], index: 3, kind: input, shape index: {}]   ;;  %s1610_s4 = inlined_call_operand.vmem [shape: f32[1,128], index: 4, kind: input, shape index: {}]   ;;  %s1611_s5 = inlined_call_operand.vmem [shape: bf16[128,128], index: 5, kind: input, shape index: {}]   ;;  %s1612_s6 = inlined_call_operand.vmem [shape: f32[1,128], index: 6, kind: input, shape index: {}]   ;;  %s1613_s7 = inlined_call_operand.vmem [shape: bf16[128,128], index: 7, kind: input, shape index: {}]   ;;  %s1614_s8 = inlined_call_operand.vmem [shape: f32[1,128], index: 8, kind: input, shape index: {}]   ;;  %s1615_s9 = inlined_call_operand.hbm [shape: f32[2,128], index: 9, kind: output, shape index: {}]  }
   0x1   :  { %15 = vsyncpa [#allocation4], 0  ;;  %s1401_s30 = smov [#allocation2]   ;;  %s1353_s13 = scalar_lea.hbm %s1607_s1, 6272 }
   0x2   :  { %s23_s10 = sshll.u32 %s1401_s30, 4  ;;  %p1354_p0 = scmp.ne.s32.totalorder %s1607_s1, %s1353_s13  ;;  %s24_s10 = int_to_ptr.vmem [resolvable:$true] %s23_s10 }
   0x3   :  { %p1357_p1 = scmp.lt.u32.totalorder %s1353_s13, %s1607_s1 }
   0x5   :  { %p1359_p2 = pnand %p1357_p1, %p1354_p0 }
   0x7   :  { %1362 = shalt.err (!%p1359_p2)
}
   0x8   :  { %s1363_s18 = scalar_lea.vmem %s24_s10, 6272  ;;  %p1368_p4 = scmp.lt.s32.totalorder %s24_s10, %s24_s10 }
   0x9   :  { %p1364_p3 = scmp.ne.s32.totalorder %s24_s10, %s1363_s18  ;;  %p1369_p5 = scmp.lt.s32.totalorder %s1363_s18, %s1363_s18 }
   0xb   :  { %p1370_p6 = por %p1369_p5, %p1368_p4 }
   0xd   :  { %p1371_p7 = pnand %p1370_p6, %p1364_p3 }
   0xf   :  { %1374 = shalt.err (!%p1371_p7)
}
  0x10   :  { %s1402_s19 = smov 64   ;;  %s1403_s20 = smov 4  }
  0x11   :  { %29 = dma.hbm_to_vmem [thread:$0]  %s1607_s1, 6272, %s24_s10, [#allocation3], %s1402_s19, %s1402_s19, %s1403_s20  }
  0x12   :  { %1397 = dma.done.wait [#allocation3], 6272  }
  0x13   :  { %1398 = vsyncadd [#allocation3], 4294961024  ;;  %v1272_v0 = vld [vmem:[#allocation2 + $0x40] sm:$0xff]   ;;  %v1276_v4 = vld [vmem:[#allocation2 + $0x48] sm:$0xff]   ;;  %v1404_v21 = vmov 1983009808   ;;  %v56_v23 = vlaneseq }
  0x14   :  { %v1273_v1 = vld [vmem:[#allocation2] sm:$0xff]   ;;  %1104 = vmatprep.subr.bf16.mxu0 %v1272_v0  ;;  %v1277_v5 = vld [vmem:[#allocation2 + $0x8] sm:$0xff]   ;;  %v1280_v8 = vld [vmem:[#allocation2 + $0x50] sm:$0xff]   ;;  %v54_v22 = vunpack.c.l.s4 %v1404_v21  ;;  %v1405_v45 = vmov 0.0   ;;  %vm1406_vm0 = vmmov 0   ;;  %vm498_vm1 = vcmask 130048  }
  0x15   :  { %v1274_v2 = vld [vmem:[#allocation2 + $0xc0] sm:$0xff]   ;;  %1105 = vmatpush3.bf16.msra.mxu0 %v1273_v1  ;;  %v1278_v6 = vld [vmem:[#allocation2 + $0xc8] sm:$0xff]   ;;  %v1281_v9 = vld [vmem:[#allocation2 + $0x10] sm:$0xff]   ;;  %v57_v29 = vshrl.u32 %v56_v23, 7 }
  0x16   :  { %v1275_v3 = vld [vmem:[#allocation2 + $0x80] sm:$0xff]   ;;  %1126 = vmatprep.subr.bf16.mxu1 %v1274_v2  ;;  %1106 = vmatprep.subr.bf16.mxu0 %v1276_v4  ;;  %v1279_v7 = vld [vmem:[#allocation2 + $0x88] sm:$0xff]   ;;  %v1282_v10 = vld [vmem:[#allocation2 + $0xd0] sm:$0xff]   ;;  %v55_v28 = vunpack.c.0.s8 %v54_v22 }
  0x17   :  { %1127 = vmatpush3.bf16.msra.mxu1 %v1275_v3  ;;  %v1283_v11 = vld [vmem:[#allocation2 + $0x90] sm:$0xff]   ;;  %v1284_v12 = vld [vmem:[#allocation2 + $0x58] sm:$0xff]   ;;  %v1288_v16 = vld [vmem:[#allocation2 + $0x60] sm:$0xff]  }
  0x18   :  { %1128 = vmatprep.subr.bf16.mxu1 %v1278_v6  ;;  %v1285_v13 = vld [vmem:[#allocation2 + $0x18] sm:$0xff]   ;;  %v1289_v17 = vld [vmem:[#allocation2 + $0x20] sm:$0xff]   ;;  %v1292_v20 = vld [vmem:[#allocation2 + $0x68] sm:$0xff]   ;;  %v58_v34 = vsub.s32 %v55_v28, %v57_v29 }
  0x19   :  { %1107 = vmatpush3.bf16.msra.mxu0 %v1277_v5  ;;  %v1286_v14 = vld [vmem:[#allocation2 + $0xd8] sm:$0xff]   ;;  %v1290_v18 = vld [vmem:[#allocation2 + $0xe0] sm:$0xff]   ;;  %v1293_v24 = vld [vmem:[#allocation2 + $0x28] sm:$0xff]  }
  0x1a   :  { %1108 = vmatprep.subr.bf16.mxu0 %v1280_v8  ;;  %v1287_v15 = vld [vmem:[#allocation2 + $0x98] sm:$0xff]   ;;  %v1291_v19 = vld [vmem:[#allocation2 + $0xa0] sm:$0xff]   ;;  %v1294_v25 = vld [vmem:[#allocation2 + $0xe8] sm:$0xff]  }
  0x1b   :  { %1129 = vmatpush3.bf16.msra.mxu1 %v1279_v7  ;;  %v1295_v26 = vld [vmem:[#allocation2 + $0xa8] sm:$0xff]   ;;  %v1296_v27 = vld [vmem:[#allocation2 + $0x70] sm:$0xff]   ;;  %v1300_v33 = vld [vmem:[#allocation2 + $0x78] sm:$0xff]  }
  0x1c   :  { %1130 = vmatprep.subr.bf16.mxu1 %v1282_v10  ;;  %v1297_v30 = vld [vmem:[#allocation2 + $0x30] sm:$0xff]   ;;  %v1301_v35 = vld [vmem:[#allocation2 + $0x38] sm:$0xff]   ;;  %v48_v37 = vld [vmem:[%s1606_s0] sm:$0xff] }
  0x1d   :  { %1109 = vmatpush3.bf16.msra.mxu0 %v1281_v9  ;;  %v1298_v31 = vld [vmem:[#allocation2 + $0xf0] sm:$0xff]   ;;  %v1302_v36 = vld [vmem:[#allocation2 + $0xf8] sm:$0xff]   ;;  %v59_v38 = vrot.slane %v48_v37, %v58_v34  ;;  %v52_v40 = vcombine.high %v48_v37, %v48_v37  ;;  %v1304_v41 = vld [vmem:[#allocation2 + $0x140] sm:$0xff]  }
  0x1e   :  { %1110 = vmatprep.subr.bf16.mxu0 %v1284_v12  ;;  %v1299_v32 = vld [vmem:[#allocation2 + $0xb0] sm:$0xff]   ;;  %v1303_v39 = vld [vmem:[#allocation2 + $0xb8] sm:$0xff]   ;;  %v1306_v48 = vld [vmem:[#allocation2 + $0x100] sm:$0xff]  }
  0x1f   :  { %1131 = vmatpush3.bf16.msra.mxu1 %v1283_v11  ;;  %v67_v42 = vcombine.high %v59_v38, %v59_v38  ;;  %v66_v43 = vrot.slane %v52_v40, %v58_v34  ;;  %v92_v44 = vpack.c.bf16 %v59_v38, %v59_v38  ;;  %v1307_v50 = vld [vmem:[#allocation2 + $0x148] sm:$0xff]   ;;  %v1309_v53 = vld [vmem:[#allocation2 + $0x150] sm:$0xff]   ;;  %v1311_v55 = vld [vmem:[#allocation2 + $0x158] sm:$0xff]  }
  0x20   :  { %1132 = vmatprep.subr.bf16.mxu1 %v1286_v14  ;;  %v1308_v52 = vld [vmem:[#allocation2 + $0x108] sm:$0xff]   ;;  %v1310_v54 = vld [vmem:[#allocation2 + $0x110] sm:$0xff]   ;;  %v1312_v56 = vld [vmem:[#allocation2 + $0x118] sm:$0xff]  }
  0x21   :  { %1111 = vmatpush3.bf16.msra.mxu0 %v1285_v13  ;;  %v93_v46 = vpack.c.bf16 %v67_v42, %v67_v42  ;;  %v68_v47 = vcombine.high %v66_v43, %v66_v43  ;;  %v94_v49 = vpack.c.bf16 %v66_v43, %v66_v43  ;;  %v1313_v57 = vld [vmem:[#allocation2 + $0x160] sm:$0xff]   ;;  %v49_v59 = vld [vmem:[%s1606_s0 + $0x8] sm:$0x3f]  ;;  %v1317_v5 = vld [vmem:[#allocation2 + $0x170] sm:$0xff]  }
  0x22   :  { %1112 = vmatprep.subr.bf16.mxu0 %v1288_v16  ;;  %v1321_v58 = vld [vmem:[#allocation2 + $0x180] sm:$0xff]   ;;  %v69_v61 = vcombine.high %v49_v59, %v49_v59  ;;  %v76_v62 = vrot.slane %v49_v59, %v58_v34  ;;  %v1315_v63 = vld [vmem:[#allocation2 + $0x168] sm:$0xff]   ;;  %v1318_v6 = vld [vmem:[#allocation2 + $0x130] sm:$0xff]  }
  0x23   :  { %1133 = vmatpush3.bf16.msra.mxu1 %v1287_v15  ;;  %534 = vmatprep.mubr.bf16.mxu0 %v93_v46  ;;  %v95_v51 = vpack.c.bf16 %v68_v47, %v68_v47  ;;  %v1314_v60 = vld [vmem:[#allocation2 + $0x120] sm:$0xff]   ;;  %v1316_v2 = vld [vmem:[#allocation2 + $0x128] sm:$0xff]   ;;  %v1319_v7 = vld [vmem:[#allocation2 + $0x178] sm:$0xff]  }
  0x24   :  { %1134 = vmatprep.subr.bf16.mxu1 %v1290_v18  ;;  %v83_v0 = vrot.slane %v69_v61, %v58_v34  ;;  %v84_v1 = vcombine.high %v76_v62, %v76_v62  ;;  %v1320_v8 = vld [vmem:[#allocation2 + $0x138] sm:$0xff]   ;;  %v96_v9 = vpack.c.bf16 %v76_v62, %v76_v62  ;;  %v1323_v10 = vld [vmem:[%s1609_s3] sm:$0xff]   ;;  %v1324_v11 = vld [vmem:[%s1609_s3 + $0x8] sm:$0xff]  }
  0x25   :  { %1113 = vmatpush3.bf16.msra.mxu0 %v1289_v17  ;;  %574 = vmatprep.mubr.bf16.mxu1 %v95_v51  ;;  %v1325_v12 = vld [vmem:[%s1609_s3 + $0x10] sm:$0xff]   ;;  %v1326_v13 = vld [vmem:[%s1609_s3 + $0x18] sm:$0xff]   ;;  %v1327_v14 = vld [vmem:[%s1609_s3 + $0x20] sm:$0xff]  }
  0x26   :  { %1114 = vmatprep.subr.bf16.mxu0 %v1292_v20  ;;  %v97_v3 = vpack.c.bf16 %v84_v1, %v84_v1  ;;  %v98_v4 = vpack.c.bf16 %v83_v0, %v83_v0  ;;  %v1328_v15 = vld [vmem:[%s1609_s3 + $0x28] sm:$0xff]   ;;  %v1329_v16 = vld [vmem:[%s1609_s3 + $0x30] sm:$0xff]   ;;  %v1330_v17 = vld [vmem:[%s1609_s3 + $0x38] sm:$0xff]  }
  0x27   :  { %1135 = vmatpush3.bf16.msra.mxu1 %v1291_v19  ;;  %v1331_v18 = vld [vmem:[%s1611_s5] sm:$0xff]   ;;  %v1332_v19 = vld [vmem:[%s1611_s5 + $0x8] sm:$0xff]   ;;  %v1333_v20 = vld [vmem:[%s1611_s5 + $0x10] sm:$0xff]  }
  0x28   :  { %1136 = vmatprep.subr.bf16.mxu1 %v1294_v25  ;;  %v1026_v22 = vld [vmem:[%s1608_s2] ss:$0 sm:$0xff]  ;;  %v1334_v51 = vld [vmem:[%s1611_s5 + $0x18] sm:$0xff]  }
  0x29   :  { %1115 = vmatpush3.bf16.msra.mxu0 %v1293_v24  ;;  %v1077_v59 = vld [vmem:[%s1610_s4] ss:$0 sm:$0xff] }
  0x2a   :  { %1116 = vmatprep.subr.bf16.mxu0 %v1296_v27 }
  0x2b   :  { %1137 = vmatpush3.bf16.msra.mxu1 %v1295_v26 }
  0x2c   :  { %1138 = vmatprep.subr.bf16.mxu1 %v1298_v31 }
  0x2d   :  { %1117 = vmatpush3.bf16.msra.mxu0 %v1297_v30 }
  0x2e   :  { %1118 = vmatprep.subr.bf16.mxu0 %v1300_v33 }
  0x2f   :  { %1139 = vmatpush3.bf16.msra.mxu1 %v1299_v32 }
  0x30   :  { %1140 = vmatprep.subr.bf16.mxu1 %v1302_v36 }
  0x31   :  { %1119 = vmatpush3.bf16.msra.mxu0 %v1301_v35 }
  0x32   :  { %1148 = vmatprep.subr.bf16.mxu0 %v1304_v41 }
  0x33   :  { %1141 = vmatpush3.bf16.msra.mxu1 %v1303_v39 }
  0x34   :  { %1199 = vmatprep.subr.bf16.mxu1 %v1405_v45  ;;  %535 = vmatmul.mubr.bf16.vlgmr.msra.gmra.mrb[0].mxu0 %v92_v44 }
  0x35   :  { %1149 = vmatpush3.bf16.msra.mxu0 %v1306_v48  ;;  %614 = vmatprep.mubr.bf16.mxu0 %v97_v3 }
  0x36   :  { %575 = vmatmul.mubr.bf16.vlgmr.msra.gmra.mrb[0].mxu1 %v94_v49  ;;  %1150 = vmatprep.subr.bf16.mxu0 %v1307_v50 }
  0x37   :  { %1201 = vmatprep.mubr.msk.bf16.mxu1 %vm1406_vm0, %v1405_v45  ;;  %1200 = vmatpush3.bf16.msra.mxu1 %v1321_v58  ;;  %v1341_v58 = vld [vmem:[%s1613_s7 + $0x10] sm:$0xff]  }
  0x38   :  { %1205 = vmatprep.subr.bf16.mxu1 %v1405_v45 }
  0x39   :  { %1151 = vmatpush3.bf16.msra.mxu0 %v1308_v52  ;;  %v1335_v52 = vld [vmem:[%s1611_s5 + $0x20] sm:$0xff]  }
  0x3a   :  { %1152 = vmatprep.subr.bf16.mxu0 %v1309_v53  ;;  %v1336_v53 = vld [vmem:[%s1611_s5 + $0x28] sm:$0xff]  }
  0x3d   :  { %1153 = vmatpush3.bf16.msra.mxu0 %v1310_v54  ;;  %v1337_v54 = vld [vmem:[%s1611_s5 + $0x30] sm:$0xff]  }
  0x3e   :  { %1154 = vmatprep.subr.bf16.mxu0 %v1311_v55  ;;  %1202 = vmatmul.mubr.msk.bf16.vlgmr.msra.gmra.mrb[4].mxu1 %vm498_vm1, %v98_v4  ;;  %v1338_v55 = vld [vmem:[%s1611_s5 + $0x38] sm:$0xff]  }
  0x3f   :  { %1221 = vmatprep.mubr.msk.bf16.mxu1 %vm1406_vm0, %v1405_v45  ;;  %1206 = vmatpush3.bf16.msra.mxu1 %v1323_v10  ;;  %v1346_v10 = vld [vmem:[%s1613_s7 + $0x38] sm:$0xff]  }
  0x40   :  { %1207 = vmatprep.subr.bf16.mxu1 %v1405_v45 }
  0x41   :  { %1155 = vmatpush3.bf16.msra.mxu0 %v1312_v56  ;;  %v1339_v56 = vld [vmem:[%s1613_s7] sm:$0xff]  }
  0x42   :  { %1156 = vmatprep.subr.bf16.mxu0 %v1313_v57  ;;  %v1340_v57 = vld [vmem:[%s1613_s7 + $0x8] sm:$0xff]  }
  0x43   :  { %1208 = vmatpush3.bf16.msra.mxu1 %v1324_v11  ;;  %v1086_v11 = vld [vmem:[%s1612_s6] ss:$0 sm:$0xff] }
  0x44   :  { %1209 = vmatprep.subr.bf16.mxu1 %v1405_v45 }
  0x45   :  { %1157 = vmatpush3.bf16.msra.mxu0 %v1314_v60 }
  0x46   :  { %1158 = vmatprep.subr.bf16.mxu0 %v1315_v63 }
  0x47   :  { %1210 = vmatpush3.bf16.msra.mxu1 %v1325_v12 }
  0x48   :  { %1211 = vmatprep.subr.bf16.mxu1 %v1405_v45 }
  0x49   :  { %1159 = vmatpush3.bf16.msra.mxu0 %v1316_v2 }
  0x4a   :  { %1160 = vmatprep.subr.bf16.mxu0 %v1317_v5 }
  0x4b   :  { %1212 = vmatpush3.bf16.msra.mxu1 %v1326_v13 }
  0x4c   :  { %1213 = vmatprep.subr.bf16.mxu1 %v1405_v45 }
  0x4d   :  { %1161 = vmatpush3.bf16.msra.mxu0 %v1318_v6  ;;  %v1342_v6 = vld [vmem:[%s1613_s7 + $0x18] sm:$0xff]  }
  0x4e   :  { %1162 = vmatprep.subr.bf16.mxu0 %v1319_v7  ;;  %v1343_v7 = vld [vmem:[%s1613_s7 + $0x20] sm:$0xff]  }
  0x4f   :  { %1214 = vmatpush3.bf16.msra.mxu1 %v1327_v14 }
  0x50   :  { %1215 = vmatprep.subr.bf16.mxu1 %v1405_v45 }
  0x51   :  { %1163 = vmatpush3.bf16.msra.mxu0 %v1320_v8  ;;  %v1344_v8 = vld [vmem:[%s1613_s7 + $0x28] sm:$0xff]  }
  0x52   :  { %1225 = vmatprep.subr.bf16.mxu0 %v1405_v45 }
  0x53   :  { %1216 = vmatpush3.bf16.msra.mxu1 %v1328_v15 }
  0x54   :  { %615 = vmatmul.mubr.bf16.vlgmr.msra.gmra.mrb[4].mxu0 %v96_v9  ;;  %1217 = vmatprep.subr.bf16.mxu1 %v1405_v45  ;;  %v1345_v9 = vld [vmem:[%s1613_s7 + $0x30] sm:$0xff]   ;;  %s1407_s7 = smov [#allocation5]  }
  0x55   :  { %1241 = vmatprep.mubr.msk.bf16.mxu0 %vm1406_vm0, %v1405_v45  ;;  %1226 = vmatpush3.bf16.msra.mxu0 %v1331_v18  ;;  %s1017_s29 = sshll.u32 %s1407_s7, 4  ;;  %s1018_s29 = int_to_ptr.vmem [resolvable:$true] %s1017_s29 }
  0x56   :  { %1227 = vmatprep.subr.bf16.mxu0 %v1405_v45  ;;  %s1375_s6 = scalar_lea.vmem %s1018_s29, 32  ;;  %p1380_p9 = scmp.lt.s32.totalorder %s1018_s29, %s1018_s29 }
  0x57   :  { %1218 = vmatpush3.bf16.msra.mxu1 %v1329_v16  ;;  %p1376_p8 = scmp.ne.s32.totalorder %s1018_s29, %s1375_s6  ;;  %p1381_p10 = scmp.lt.s32.totalorder %s1375_s6, %s1375_s6 }
  0x58   :  { %1219 = vmatprep.subr.bf16.mxu1 %v1405_v45 }
  0x59   :  { %1228 = vmatpush3.bf16.msra.mxu0 %v1332_v19  ;;  %p1382_p11 = por %p1381_p10, %p1380_p9 }
  0x5a   :  { %1229 = vmatprep.subr.bf16.mxu0 %v1405_v45 }
  0x5b   :  { %1220 = vmatpush3.bf16.msra.mxu1 %v1330_v17  ;;  %p1383_p12 = pnand %p1382_p11, %p1376_p8 }
  0x5c   :  { %1245 = vmatprep.subr.bf16.mxu1 %v1405_v45 }
  0x5d   :  { %1230 = vmatpush3.bf16.msra.mxu0 %v1333_v20 }
  0x5e   :  { %1231 = vmatprep.subr.bf16.mxu0 %v1405_v45 }
  0x61   :  { %1232 = vmatpush3.bf16.msra.mxu0 %v1334_v51 }
  0x62   :  { %1233 = vmatprep.subr.bf16.mxu0 %v1405_v45 }
  0x65   :  { %1234 = vmatpush3.bf16.msra.mxu0 %v1335_v52 }
  0x66   :  { %1235 = vmatprep.subr.bf16.mxu0 %v1405_v45 }
  0x69   :  { %1236 = vmatpush3.bf16.msra.mxu0 %v1336_v53 }
  0x6a   :  { %1237 = vmatprep.subr.bf16.mxu0 %v1405_v45 }
  0x6d   :  { %1238 = vmatpush3.bf16.msra.mxu0 %v1337_v54 }
  0x6e   :  { %1239 = vmatprep.subr.bf16.mxu0 %v1405_v45 }
  0x71   :  { %1240 = vmatpush3.bf16.msra.mxu0 %v1338_v55 }
 0x107   :  { %v1120_v21 = vpop.f32.mrb[0].mxu0 }
 0x108   :  { %v1121_v23 = vpop.f32.mrb[1].mxu0 }
 0x109   :  { %v1122_v24 = vadd.f32 %v1121_v23, %v1120_v21  ;;  %v1123_v25 = vpop.f32.mrb[2].mxu0  ;;  %v1142_v26 = vpop.f32.mrb[0].mxu1  ;;  %v1095_v21 = vld [vmem:[%s1614_s8] ss:$0 sm:$0xff] }
 0x10a   :  { %v1124_v27 = vpop.f32.mrb[3].mxu0  ;;  %v1143_v28 = vpop.f32.mrb[1].mxu1 }
 0x10b   :  { %v537_v29 = vadd.f32 %v1122_v24, %v1026_v22  ;;  %v1144_v30 = vadd.f32 %v1143_v28, %v1142_v26  ;;  %v1145_v31 = vpop.f32.mrb[2].mxu1 }
 0x10c   :  { %v1146_v32 = vpop.f32.mrb[3].mxu1 }
 0x10d   :  { %v577_v33 = vadd.f32 %v1144_v30, %v537_v29 }
 0x111   :  { %v656_v34 = vpop.f32.mrb[4].mxu1 }
 0x112   :  { %v1203_v35 = vpop.f32.mrb[5].mxu1 }
 0x113   :  { %v659_v36 = vpop.f32.mrb[6].mxu1 }
 0x114   :  { %v1204_v37 = vpop.f32.mrb[7].mxu1 }
 0x127   :  { %v1164_v38 = vpop.f32.mrb[4].mxu0 }
 0x128   :  { %v1165_v39 = vpop.f32.mrb[5].mxu0 }
 0x129   :  { %v1166_v40 = vadd.f32 %v1165_v39, %v1164_v38  ;;  %v1167_v41 = vpop.f32.mrb[6].mxu0 }
 0x12a   :  { %v1168_v42 = vpop.f32.mrb[7].mxu0 }
 0x12b   :  { %v617_v43 = vadd.f32 %v1166_v40, %v577_v33 }
 0x12d   :  { %v657_v44 = vadd.f32 %v656_v34, %v617_v43 }
 0x12f   :  { %v662_v46 = vmul.f32 0.5, %v657_v44 }
 0x131   :  { %1347 = vtanh.f32 %v662_v46 }
 0x13b   :  { %v1348_v47 = vpop.eup %1347 }
 0x13c   :  { %v664_v48 = vmul.f32 0.5, %v1348_v47 }
 0x13e   :  { %v665_v49 = vadd.f32 0.5, %v664_v48 }
 0x140   :  { %v666_v50 = vpack.c.bf16 %v665_v49, %v665_v49 }
 0x142   :  { %1222 = vmatmul.mubr.bf16.vlgmr.msra.gmra.mrb[8].mxu1 %v666_v50 }
 0x143   :  { %1261 = vmatprep.mubr.msk.bf16.mxu1 %vm1406_vm0, %v1405_v45  ;;  %1246 = vmatpush3.bf16.msra.mxu1 %v1339_v56 }
 0x144   :  { %1247 = vmatprep.subr.bf16.mxu1 %v1405_v45 }
 0x147   :  { %1248 = vmatpush3.bf16.msra.mxu1 %v1340_v57 }
 0x148   :  { %1249 = vmatprep.subr.bf16.mxu1 %v1405_v45 }
 0x14b   :  { %1250 = vmatpush3.bf16.msra.mxu1 %v1341_v58 }
 0x14c   :  { %1251 = vmatprep.subr.bf16.mxu1 %v1405_v45 }
 0x14f   :  { %1252 = vmatpush3.bf16.msra.mxu1 %v1342_v6 }
 0x150   :  { %1253 = vmatprep.subr.bf16.mxu1 %v1405_v45 }
 0x153   :  { %1254 = vmatpush3.bf16.msra.mxu1 %v1343_v7 }
 0x154   :  { %1255 = vmatprep.subr.bf16.mxu1 %v1405_v45 }
 0x157   :  { %1256 = vmatpush3.bf16.msra.mxu1 %v1344_v8 }
 0x158   :  { %1257 = vmatprep.subr.bf16.mxu1 %v1405_v45 }
 0x15b   :  { %1258 = vmatpush3.bf16.msra.mxu1 %v1345_v9 }
 0x15c   :  { %1259 = vmatprep.subr.bf16.mxu1 %v1405_v45 }
 0x15f   :  { %1260 = vmatpush3.bf16.msra.mxu1 %v1346_v10 }
 0x215   :  { %v772_v60 = vpop.f32.mrb[8].mxu1 }
 0x216   :  { %v773_v61 = vadd.f32 %v1077_v59, %v772_v60  ;;  %v1223_v62 = vpop.f32.mrb[9].mxu1 }
 0x217   :  { %v775_v63 = vpop.f32.mrb[10].mxu1 }
 0x218   :  { %v778_v0 = vmul.f32 0.5, %v773_v61  ;;  %v1224_v1 = vpop.f32.mrb[11].mxu1 }
 0x21a   :  { %1349 = vtanh.f32 %v778_v0 }
 0x224   :  { %v1350_v2 = vpop.eup %1349 }
 0x225   :  { %v780_v3 = vmul.f32 0.5, %v1350_v2 }
 0x227   :  { %v781_v4 = vadd.f32 0.5, %v780_v3 }
 0x229   :  { %v782_v5 = vpack.c.bf16 %v781_v4, %v781_v4 }
 0x22b   :  { %1242 = vmatmul.mubr.bf16.vlgmr.msra.gmra.mrb[8].mxu0 %v782_v5 }
 0x2fe   :  { %v888_v12 = vpop.f32.mrb[8].mxu0 }
 0x2ff   :  { %v889_v13 = vadd.f32 %v1086_v11, %v888_v12  ;;  %v1243_v14 = vpop.f32.mrb[9].mxu0 }
 0x300   :  { %v891_v15 = vpop.f32.mrb[10].mxu0 }
 0x301   :  { %v894_v16 = vmul.f32 0.5, %v889_v13  ;;  %v1244_v17 = vpop.f32.mrb[11].mxu0 }
 0x303   :  { %1351 = vtanh.f32 %v894_v16 }
 0x30d   :  { %v1352_v18 = vpop.eup %1351 }
 0x30e   :  { %v896_v19 = vmul.f32 0.5, %v1352_v18 }
 0x310   :  { %v897_v20 = vadd.f32 0.5, %v896_v19 }
 0x312   :  { %v898_v45 = vpack.c.bf16 %v897_v20, %v897_v20 }
 0x314   :  { %1262 = vmatmul.mubr.bf16.vlgmr.msra.gmra.mrb[12].mxu1 %v898_v45 }
 0x3e7   :  { %v1004_v22 = vpop.f32.mrb[12].mxu1 }
 0x3e8   :  { %v1005_v23 = vadd.f32 %v1095_v21, %v1004_v22  ;;  %v1263_v24 = vpop.f32.mrb[13].mxu1 }
 0x3e9   :  { %v1007_v25 = vpop.f32.mrb[14].mxu1 }
 0x3ea   :  { %1010 = vst [vmem:[#allocation5] sm:$0x3] %v1005_v23  ;;  %v1264_v26 = vpop.f32.mrb[15].mxu1 }
 0x3eb   :  { %1386 = shalt.err (!%p1383_p12)
}
 0x3ec   :  { %s1387_s8 = scalar_lea.hbm %s1615_s9, 32 }
 0x3ed   :  { %p1388_p13 = scmp.ne.s32.totalorder %s1615_s9, %s1387_s8  ;;  %p1391_p0 = scmp.lt.u32.totalorder %s1387_s8, %s1615_s9 }
 0x3ef   :  { %p1393_p1 = pnand %p1391_p0, %p1388_p13 }
 0x3f1   :  { %1396 = shalt.err (!%p1393_p1)
}
 0x3f2   :  { %1020 = dma.vmem_to_hbm [thread:$0]  %s1018_s29, 32, %s1615_s9, [#allocation4]  }
 0x3f3   :  { %1399 = dma.done.wait [#allocation4], 32  }
 0x3f4   :  { %1400 = vsyncadd [#allocation4], 4294967264 }
 0x3f5   :  { %1024 = vsyncpa [#allocation3], 1 }
 0x3f6   :  { %1025 = vsyncpa [#allocation4], 1 }

</bundles_post_ra>
